<compile_context>
chip_gen: v6e
topology: v6e:2x2x1
jax: 0.10.0
libtpu: 0.0.40
codegen_flags: <defaults>
</compile_context>

<pallas_src>
import jax
import jax.numpy as jnp
from jax.experimental import pallas as pl
from jax.experimental.pallas import tpu as pltpu


def _round_up(x, m):
    return ((x + m - 1) // m) * m


def _pick_tile(dim, unit, cap):
    """Largest multiple of `unit` that divides `dim` (a multiple of `unit`) and is <= cap."""
    cap = max(cap, unit)
    best = unit
    t = unit
    while t <= min(dim, cap):
        if dim % t == 0:
            best = t
        t += unit
    return best


def prediction_head_matmul(x2d, w_nk, bias, *, out_dtype,
                           tm_cap=256, tn_cap=512, tk_cap=1024):
    """x2d: [M, K], w_nk: [N, K] (nn.Linear layout), bias: [N] -> [M, N] in out_dtype."""
    M, K = x2d.shape
    N, K2 = w_nk.shape
    assert K == K2, "weight inner dim must match flattened head_dim"

    # Pad everything to lane/sublane-friendly sizes (8 on sublane, 128 on lane).
    M_pad = _round_up(M, 8)
    K_pad = _round_up(K, 128)
    N_pad = _round_up(N, 128)

    tm = _pick_tile(M_pad, 8, tm_cap)
    tn = _pick_tile(N_pad, 128, tn_cap)
    tk = _pick_tile(K_pad, 128, tk_cap)

    if (M_pad, K_pad) != (M, K):
        x2d = jnp.pad(x2d, ((0, M_pad - M), (0, K_pad - K)))
    if (N_pad, K_pad) != (N, K):
        w_nk = jnp.pad(w_nk, ((0, N_pad - N), (0, K_pad - K)))
    if N_pad != N:
        bias = jnp.pad(bias, (0, N_pad - N))
    bias2d = bias.reshape(1, N_pad).astype(jnp.float32)

    grid = (M_pad // tm, N_pad // tn, K_pad // tk)

    def kernel(x_ref, w_ref, b_ref, o_ref, acc_ref):
        k = pl.program_id(2)

        @pl.when(k == 0)
        def _():
            acc_ref[...] = jnp.zeros_like(acc_ref)

        # X tile [tm, tk] contracted against W tile [tn, tk] on their last dims
        # (i.e. X @ W^T) — no transposed copy of the weight is ever materialized.
        acc_ref[...] += jax.lax.dot_general(
            x_ref[...], w_ref[...],
            dimension_numbers=(((1,), (1,)), ((), ())),
            preferred_element_type=jnp.float32,
        )

        @pl.when(k == pl.num_programs(2) - 1)
        def _():
            o_ref[...] = (acc_ref[...] + b_ref[...]).astype(o_ref.dtype)

    out = pl.pallas_call(
        kernel,
        out_shape=jax.ShapeDtypeStruct((M_pad, N_pad), out_dtype),
        grid_spec=pltpu.PrefetchScalarGridSpec(
            num_scalar_prefetch=0,
            grid=grid,
            in_specs=[
                pl.BlockSpec((tm, tk), lambda i, j, k: (i, k)),   # X tile
                pl.BlockSpec((tn, tk), lambda i, j, k: (j, k)),   # W tile (native [N,K])
                pl.BlockSpec((1, tn), lambda i, j, k: (0, j)),    # bias tile (tiny)
            ],
            out_specs=pl.BlockSpec((tm, tn), lambda i, j, k: (i, j)),
            scratch_shapes=[pltpu.VMEM((tm, tn), jnp.float32)],
        ),
        compiler_params=pltpu.CompilerParams(
            dimension_semantics=("parallel", "parallel", "arbitrary"),
        ),
    )(x2d, w_nk, bias2d)

    return out[:M, :N]


def prediction_head_forward(x, weight, bias, *, compute_dtype=None,
                            tm_cap=256, tn_cap=512, tk_cap=1024):
    """Full PredictionHead forward.

    x:      [B, n_vars, d_model, num_patch]
    weight: [forecast_len, head_dim]   (PyTorch nn.Linear layout, head_dim = d_model*num_patch)
    bias:   [forecast_len]
    returns [B, forecast_len, n_vars]
    """
    B, n_vars, d_model, num_patch = x.shape
    head_dim = d_model * num_patch
    forecast_len = weight.shape[0]

    # flatten(start_dim=-2): d_model outer, num_patch inner.
    x2d = x.reshape(B * n_vars, head_dim)
    out_dtype = x.dtype
    # TODO(synk): dropout omitted — identity at inference / head_dropout=0.

    if compute_dtype is not None:
        # Optional bf16 operands for v6e/v7x (f32 accumulation + f32 bias kept in-kernel).
        x2d = x2d.astype(compute_dtype)
        weight = weight.astype(compute_dtype)

    y2d = prediction_head_matmul(
        x2d, weight, bias, out_dtype=out_dtype,
        tm_cap=tm_cap, tn_cap=tn_cap, tk_cap=tk_cap,
    )
    y = y2d.reshape(B, n_vars, forecast_len)
    # Keep the kernel output lane-dense [M, forecast_len]; the cheap transpose stays in XLA.
    return jnp.transpose(y, (0, 2, 1))  # [B, forecast_len, n_vars]


if __name__ == "__main__":
    # Small shapes that deliberately exercise the padding paths:
    #   M = B*n_vars = 6 (pads to 8), K = 20*12 = 240 (pads to 256), N = 96 (pads to 128).
    B, n_vars, d_model, num_patch = 2, 3, 20, 12
    forecast_len = 96
    head_dim = d_model * num_patch

    key = jax.random.PRNGKey(0)
    kx, kw, kb = jax.random.split(key, 3)

    x = jax.random.normal(kx, (B, n_vars, d_model, num_patch), dtype=jnp.float32)
    bound = 1.0 / (head_dim ** 0.5)
    weight = jax.random.uniform(
        kw, (forecast_len, head_dim), minval=-bound, maxval=bound, dtype=jnp.float32
    )
    bias = jax.random.uniform(
        kb, (forecast_len,), minval=-bound, maxval=bound, dtype=jnp.float32
    )

    y = prediction_head_forward(x, weight, bias)
    y = jax.block_until_ready(y)

    # Pure-JAX reference check.
    ref = jnp.transpose(
        x.reshape(B, n_vars, head_dim) @ weight.T + bias, (0, 2, 1)
    )
    assert y.shape == (B, forecast_len, n_vars)
    assert jnp.allclose(y, ref, atol=1e-4, rtol=1e-4)

    print("KERNEL_OK")
</pallas_src>

<mosaic_0001>
module attributes {stable_mosaic.version = 11 : i64} {
  func.func @kernel(%arg0: i32, %arg1: i32, %arg2: i32, %arg3: memref<8x256xf32, #tpu.memory_space<vmem>>, %arg4: memref<128x256xf32, #tpu.memory_space<vmem>>, %arg5: memref<1x128xf32, #tpu.memory_space<vmem>>, %arg6: memref<8x128xf32, #tpu.memory_space<vmem>>, %arg7: memref<8x128xf32, #tpu.memory_space<vmem>>) attributes {dimension_semantics = [#tpu.dimension_semantics<parallel>, #tpu.dimension_semantics<parallel>, #tpu.dimension_semantics<arbitrary>], iteration_bounds = array<i64: 1, 1, 1>, scalar_prefetch = 0 : i64, scratch_operands = 1 : i64, tpu.core_type = #tpu.core_type<tc>, window_params = [{transform_indices = @transform_0, window_bounds = array<i64: 8, 256>}, {transform_indices = @transform_1, window_bounds = array<i64: 128, 256>}, {transform_indices = @transform_2, window_bounds = array<i64: 1, 128>}, {transform_indices = @transform_3, window_bounds = array<i64: 8, 128>}]} {
    %c0_i32 = arith.constant 0 : i32
    %0 = arith.cmpi eq, %arg2, %c0_i32 : i32
    %1 = arith.extui %0 : i1 to i32
    %c0_i32_0 = arith.constant 0 : i32
    %2 = arith.cmpi ne, %1, %c0_i32_0 : i32
    scf.if %2 {
      %cst_10 = arith.constant 0.000000e+00 : f32
      %12 = vector.broadcast %cst_10 : f32 to vector<8x128xf32>
      %c0_11 = arith.constant 0 : index
      %c0_12 = arith.constant 0 : index
      %13 = vector.load %arg7[%c0_11, %c0_12] : memref<8x128xf32, #tpu.memory_space<vmem>>, vector<8x128xf32>
      tpu.vector_store %arg7[%c0_11, %c0_12], %12 {strides = array<i32>} : memref<8x128xf32, #tpu.memory_space<vmem>>, vector<8x128xf32>,
    } else {
    }
    %c0 = arith.constant 0 : index
    %c0_1 = arith.constant 0 : index
    %3 = vector.load %arg7[%c0, %c0_1] : memref<8x128xf32, #tpu.memory_space<vmem>>, vector<8x128xf32>
    %c0_2 = arith.constant 0 : index
    %c0_3 = arith.constant 0 : index
    %4 = vector.load %arg3[%c0_2, %c0_3] : memref<8x256xf32, #tpu.memory_space<vmem>>, vector<8x256xf32>
    %c0_4 = arith.constant 0 : index
    %c0_5 = arith.constant 0 : index
    %5 = vector.load %arg4[%c0_4, %c0_5] : memref<128x256xf32, #tpu.memory_space<vmem>>, vector<128x256xf32>
    %cst = arith.constant dense<0.000000e+00> : vector<8x128xf32>
    %6 = tpu.matmul %4, %5, %cst {dimension_numbers = #tpu.dot_dimension_numbers<[1], [1], [0], [0], [0, 0, 1, 0], [], []>} : vector<8x256xf32>, vector<128x256xf32>, vector<8x128xf32> -> vector<8x128xf32>
    %7 = arith.addf %3, %6 : vector<8x128xf32>
    %c0_6 = arith.constant 0 : index
    %c0_7 = arith.constant 0 : index
    %8 = vector.load %arg7[%c0_6, %c0_7] : memref<8x128xf32, #tpu.memory_space<vmem>>, vector<8x128xf32>
    tpu.vector_store %arg7[%c0_6, %c0_7], %7 {strides = array<i32>} : memref<8x128xf32, #tpu.memory_space<vmem>>, vector<8x128xf32>,
    %c0_i32_8 = arith.constant 0 : i32
    %9 = arith.cmpi eq, %arg2, %c0_i32_8 : i32
    %10 = arith.extui %9 : i1 to i32
    %c0_i32_9 = arith.constant 0 : i32
    %11 = arith.cmpi ne, %10, %c0_i32_9 : i32
    scf.if %11 {
      %c0_10 = arith.constant 0 : index
      %c0_11 = arith.constant 0 : index
      %12 = vector.load %arg7[%c0_10, %c0_11] : memref<8x128xf32, #tpu.memory_space<vmem>>, vector<8x128xf32>
      %c0_12 = arith.constant 0 : index
      %c0_13 = arith.constant 0 : index
      %13 = vector.load %arg5[%c0_12, %c0_13] : memref<1x128xf32, #tpu.memory_space<vmem>>, vector<1x128xf32>
      %14 = vector.broadcast %13 : vector<1x128xf32> to vector<8x128xf32>
      %15 = arith.addf %12, %14 : vector<8x128xf32>
      %c0_14 = arith.constant 0 : index
      %c0_15 = arith.constant 0 : index
      %16 = vector.load %arg6[%c0_14, %c0_15] : memref<8x128xf32, #tpu.memory_space<vmem>>, vector<8x128xf32>
      tpu.vector_store %arg6[%c0_14, %c0_15], %15 {strides = array<i32>} : memref<8x128xf32, #tpu.memory_space<vmem>>, vector<8x128xf32>,
    } else {
    }
    return
  }
  func.func @transform_0(%arg0: i32, %arg1: i32, %arg2: i32) -> (i32, i32) {
    %c0_i32 = arith.constant 0 : i32
    return %arg0, %arg2 : i32, i32
  }
  func.func @transform_1(%arg0: i32, %arg1: i32, %arg2: i32) -> (i32, i32) {
    %c0_i32 = arith.constant 0 : i32
    return %arg1, %arg2 : i32, i32
  }
  func.func @transform_2(%arg0: i32, %arg1: i32, %arg2: i32) -> (i32, i32) {
    %c0_i32 = arith.constant 0 : i32
    %c0_i32_0 = arith.constant 0 : i32
    return %c0_i32, %arg1 : i32, i32
  }
  func.func @transform_3(%arg0: i32, %arg1: i32, %arg2: i32) -> (i32, i32) {
    %c0_i32 = arith.constant 0 : i32
    return %arg0, %arg1 : i32, i32
  }
}

</mosaic_0001>

<bundles_post_ra>
// kernel: tpu_custom_call.1
= control target key start
LH: loop header
LB: loop body
LE: loop exit
PB: predicated region body
PF: predicated region fallthrough
CT: control target
= control target key end

     0   :  { %8 = vsyncpa [#allocation4], 0  ;;  %s291_s0 = inlined_call_operand.hbm [shape: f32[8,256], index: 0, kind: input, shape index: {}]   ;;  %s292_s1 = inlined_call_operand.hbm [shape: f32[128,256], index: 1, kind: input, shape index: {}]   ;;  %s293_s2 = inlined_call_operand.vmem [shape: f32[1,128], index: 2, kind: input, shape index: {}]   ;;  %s294_s3 = inlined_call_operand.hbm [shape: f32[8,128], index: 3, kind: output, shape index: {}]  }
   0x1   :  { %9 = vsyncpa [#allocation7], 0 }
   0x2   :  { %10 = vsyncpa [#allocation5], 0  ;;  %s254_s12 = smov [#allocation3]   ;;  %s255_s14 = smov [#allocation6]  }
   0x3   :  { %s17_s13 = sshll.u32 %s254_s12, 4  ;;  %s26_s15 = sshll.u32 %s255_s14, 4  ;;  %s18_s13 = int_to_ptr.vmem [resolvable:$true] %s17_s13  ;;  %s27_s15 = int_to_ptr.vmem [resolvable:$true] %s26_s15 }
   0x4   :  { %s196_s16 = scalar_lea.vmem %s18_s13, 256  ;;  %p201_p1 = scmp.lt.s32.totalorder %s18_s13, %s18_s13 }
   0x5   :  { %p197_p0 = scmp.ne.s32.totalorder %s18_s13, %s196_s16  ;;  %p202_p2 = scmp.lt.s32.totalorder %s196_s16, %s196_s16 }
   0x7   :  { %p203_p3 = por %p202_p2, %p201_p1 }
   0x9   :  { %p204_p4 = pnand %p203_p3, %p197_p0 }
   0xb   :  { %207 = shalt.err (!%p204_p4)
}
   0xc   :  { %20 = dma.hbm_to_vmem [thread:$0]  %s291_s0, 256, %s18_s13, [#allocation4]  }
   0xd   :  { %s216_s19 = scalar_lea.vmem %s27_s15, 4096  ;;  %p221_p6 = scmp.lt.s32.totalorder %s27_s15, %s27_s15 }
   0xe   :  { %p217_p5 = scmp.ne.s32.totalorder %s27_s15, %s216_s19  ;;  %p222_p7 = scmp.lt.s32.totalorder %s216_s19, %s216_s19 }
  0x10   :  { %p223_p8 = por %p222_p7, %p221_p6 }
  0x12   :  { %p224_p9 = pnand %p223_p8, %p217_p5 }
  0x14   :  { %227 = shalt.err (!%p224_p9)
}
  0x15   :  { %s256_s20 = smov 256   ;;  %s257_s21 = smov 16  }
  0x16   :  { %32 = dma.hbm_to_vmem [thread:$0]  %s292_s1, 4096, %s27_s15, [#allocation7], %s256_s20, %s256_s20, %s257_s21  }
  0x17   :  { %248 = dma.done.wait [#allocation4], 256  }
  0x18   :  { %249 = vsyncadd [#allocation4], 4294967040 }
  0x19   :  { %250 = dma.done.wait [#allocation7], 4096  }
  0x1a   :  { %251 = vsyncadd [#allocation7], 4294963200  ;;  %v80_v0 = vld [vmem:[#allocation6 + $0xf8] sm:$0xff]  ;;  %v79_v1 = vld [vmem:[#allocation6 + $0xf0] sm:$0xff]  ;;  %s258_s24 = smov [#allocation8]  }
  0x1b   :  { %v78_v2 = vld [vmem:[#allocation6 + $0xe8] sm:$0xff]  ;;  %81 = vmatprep.subr.mxu0 %v80_v0  ;;  %v77_v3 = vld [vmem:[#allocation6 + $0xe0] sm:$0xff]  ;;  %v76_v4 = vld [vmem:[#allocation6 + $0xd8] sm:$0xff]  ;;  %s172_s25 = sshll.u32 %s258_s24, 4  ;;  %s173_s25 = int_to_ptr.vmem [resolvable:$true] %s172_s25 }
  0x1c   :  { %82 = vmatpush1.xpose.msra.mxu0 %v79_v1  ;;  %v75_v5 = vld [vmem:[#allocation6 + $0xd0] sm:$0xff]  ;;  %v74_v6 = vld [vmem:[#allocation6 + $0xc8] sm:$0xff]  ;;  %v48_v7 = vld [vmem:[#allocation3 + $0x8] sm:$0xff]  ;;  %s228_s26 = scalar_lea.vmem %s173_s25, 128  ;;  %p233_p11 = scmp.lt.s32.totalorder %s173_s25, %s173_s25 }
  0x1d   :  { %83 = vmatprep.subr.mxu0 %v78_v2  ;;  %v73_v8 = vld [vmem:[#allocation6 + $0xc0] sm:$0xff]  ;;  %145 = vmatprep.mubr.f32.mxu0 %v48_v7  ;;  %v72_v9 = vld [vmem:[#allocation6 + $0xb8] sm:$0xff]  ;;  %v71_v10 = vld [vmem:[#allocation6 + $0xb0] sm:$0xff]  ;;  %p229_p10 = scmp.ne.s32.totalorder %s173_s25, %s228_s26  ;;  %p234_p12 = scmp.lt.s32.totalorder %s228_s26, %s228_s26 }
  0x1e   :  { %v70_v11 = vld [vmem:[#allocation6 + $0xa8] sm:$0xff]  ;;  %v69_v12 = vld [vmem:[#allocation6 + $0xa0] sm:$0xff]  ;;  %v68_v13 = vld [vmem:[#allocation6 + $0x98] sm:$0xff] }
  0x1f   :  { %v67_v14 = vld [vmem:[#allocation6 + $0x90] sm:$0xff]  ;;  %v66_v15 = vld [vmem:[#allocation6 + $0x88] sm:$0xff]  ;;  %v65_v16 = vld [vmem:[#allocation6 + $0x80] sm:$0xff]  ;;  %p235_p13 = por %p234_p12, %p233_p11 }
  0x20   :  { %84 = vmatpush1.xpose.msra.mxu0 %v77_v3  ;;  %v64_v17 = vld [vmem:[#allocation6 + $0x78] sm:$0xff]  ;;  %v63_v18 = vld [vmem:[#allocation6 + $0x70] sm:$0xff]  ;;  %v62_v19 = vld [vmem:[#allocation6 + $0x68] sm:$0xff] }
  0x21   :  { %85 = vmatprep.subr.mxu0 %v76_v4  ;;  %v61_v20 = vld [vmem:[#allocation6 + $0x60] sm:$0xff]  ;;  %v60_v21 = vld [vmem:[#allocation6 + $0x58] sm:$0xff]  ;;  %v59_v22 = vld [vmem:[#allocation6 + $0x50] sm:$0xff]  ;;  %p236_p0 = pnand %p235_p13, %p229_p10 }
  0x22   :  { %v58_v23 = vld [vmem:[#allocation6 + $0x48] sm:$0xff]  ;;  %v57_v24 = vld [vmem:[#allocation6 + $0x40] sm:$0xff]  ;;  %v56_v25 = vld [vmem:[#allocation6 + $0x38] sm:$0xff] }
  0x23   :  { %v55_v26 = vld [vmem:[#allocation6 + $0x30] sm:$0xff]  ;;  %v54_v27 = vld [vmem:[#allocation6 + $0x28] sm:$0xff]  ;;  %v53_v28 = vld [vmem:[#allocation6 + $0x20] sm:$0xff] }
  0x24   :  { %86 = vmatpush1.xpose.msra.mxu0 %v75_v5  ;;  %v52_v29 = vld [vmem:[#allocation6 + $0x18] sm:$0xff]  ;;  %v51_v30 = vld [vmem:[#allocation6 + $0x10] sm:$0xff]  ;;  %v50_v31 = vld [vmem:[#allocation6 + $0x8] sm:$0xff] }
  0x25   :  { %87 = vmatprep.subr.mxu0 %v74_v6  ;;  %v49_v32 = vld [vmem:[#allocation6] sm:$0xff]  ;;  %v47_v33 = vld [vmem:[#allocation3] sm:$0xff] }
  0x26   :  { %v182_v34 = vld [vmem:[%s293_s2] ss:$0 sm:$0xff] }
  0x28   :  { %88 = vmatpush1.xpose.msra.mxu0 %v73_v8 }
  0x29   :  { %89 = vmatprep.subr.mxu0 %v72_v9 }
  0x2c   :  { %90 = vmatpush1.xpose.msra.mxu0 %v71_v10 }
  0x2d   :  { %91 = vmatprep.subr.mxu0 %v70_v11 }
  0x30   :  { %92 = vmatpush1.xpose.msra.mxu0 %v69_v12 }
  0x31   :  { %93 = vmatprep.subr.mxu0 %v68_v13 }
  0x34   :  { %94 = vmatpush1.xpose.msra.mxu0 %v67_v14 }
  0x35   :  { %95 = vmatprep.subr.mxu0 %v66_v15 }
  0x38   :  { %96 = vmatpush1.xpose.msra.mxu0 %v65_v16 }
  0x39   :  { %97 = vmatprep.subr.mxu0 %v64_v17 }
  0x3c   :  { %98 = vmatpush1.xpose.msra.mxu0 %v63_v18 }
  0x3d   :  { %99 = vmatprep.subr.mxu0 %v62_v19 }
  0x40   :  { %100 = vmatpush1.xpose.msra.mxu0 %v61_v20 }
  0x41   :  { %101 = vmatprep.subr.mxu0 %v60_v21 }
  0x44   :  { %102 = vmatpush1.xpose.msra.mxu0 %v59_v22 }
  0x45   :  { %103 = vmatprep.subr.mxu0 %v58_v23 }
  0x48   :  { %104 = vmatpush1.xpose.msra.mxu0 %v57_v24 }
  0x49   :  { %105 = vmatprep.subr.mxu0 %v56_v25 }
  0x4c   :  { %106 = vmatpush1.xpose.msra.mxu0 %v55_v26 }
  0x4d   :  { %107 = vmatprep.subr.mxu0 %v54_v27 }
  0x50   :  { %108 = vmatpush1.xpose.msra.mxu0 %v53_v28 }
  0x51   :  { %109 = vmatprep.subr.mxu0 %v52_v29 }
  0x54   :  { %110 = vmatpush1.xpose.msra.mxu0 %v51_v30 }
  0x55   :  { %111 = vmatprep.subr.mxu0 %v50_v31 }
  0x58   :  { %112 = vmatpush1.xpose.msra.mxu0 %v49_v32 }
  0x5b   :  { %146 = vmatmul.mubr.f32.vlgmr.msra.gmra.mxu0 %v47_v33 }
 0x11b   :  { %v147_v35 = vpop.f32.mrf.mxu0 }
 0x11c   :  { %v164_v36 = vadd.f32 %v182_v34, %v147_v35 }
 0x11d   :  { %v149_v37 = vpop.f32.mrf.mxu0 }
 0x11e   :  { %165 = vst [vmem:[#allocation8] sm:$0xff] %v164_v36 }
 0x11f   :  { %239 = shalt.err (!%p236_p0)
}
 0x120   :  { %175 = dma.vmem_to_hbm [thread:$0]  %s173_s25, 128, %s294_s3, [#allocation5]  }
 0x121   :  { %252 = dma.done.wait [#allocation5], 128  }
 0x122   :  { %253 = vsyncadd [#allocation5], 4294967168 }
 0x123   :  { %179 = vsyncpa [#allocation4], 1 }
 0x124   :  { %180 = vsyncpa [#allocation7], 1 }
 0x125   :  { %181 = vsyncpa [#allocation5], 1 }

</bundles_post_ra>
